<compile_context>
chip_gen: v5e
topology: v5e:2x2
jax: 0.10.0
libtpu: 0.0.40
codegen_flags: <defaults>
</compile_context>

<pallas_src>
import functools

import numpy as np
import jax
import jax.numpy as jnp
from jax.experimental import pallas as pl
from jax.experimental.pallas import tpu as pltpu

BN_EPS = 1e-5

_VMEM = pl.BlockSpec(memory_space=pltpu.MemorySpace.VMEM)


# --------------------------------------------------------------------------- #
# One-time probe of the hardware rotate convention (outside the hot path).
# Guarantees the in-kernel tap shifts are correct regardless of whether
# pltpu.roll follows np.roll (out[i] = in[i - shift]) or the opposite sign.
# --------------------------------------------------------------------------- #
_ROLL_LIKE_NUMPY = None


def _roll_like_numpy():
    global _ROLL_LIKE_NUMPY
    if _ROLL_LIKE_NUMPY is None:
        def probe(x_ref, o_ref):
            o_ref[...] = pltpu.roll(x_ref[...], 1, axis=1)

        x = jnp.broadcast_to(jnp.arange(128, dtype=jnp.float32), (8, 128))
        out = pl.pallas_call(
            probe,
            out_shape=jax.ShapeDtypeStruct((8, 128), jnp.float32),
            in_specs=[_VMEM], out_specs=_VMEM,
        )(x)
        _ROLL_LIKE_NUMPY = bool(jax.device_get(out)[0, 0] == 127.0)
    return _ROLL_LIKE_NUMPY


# --------------------------------------------------------------------------- #
# Fused kernel: conv1+BN+ReLU -> conv2+BN+ReLU -> transition conv -> AvgPool2d
#               -> ChannelSE, all in VMEM.
# --------------------------------------------------------------------------- #
def _make_fused_kernel(H, W, F, P, roll_like_numpy):
    inv_p = 1.0 / float(P)
    taps = [(di, dj) for di in (-1, 0, 1) for dj in (-1, 0, 1)]  # (kh, kw) order

    def kernel(px_ref, w1x_ref, g1_ref, b1_ref,
               w2x_ref, w2h_ref, g2_ref, b2_ref,
               wtx_ref, wt1_ref, wt2_ref, tb_ref,
               pool_ref, sqd_ref, ex_ref,
               f1w_ref, f1b_ref, f2w_ref, f2b_ref,
               out_ref, ph1_ref, ph2_ref):
        f32 = jnp.float32
        px = px_ref[...]                                   # (Kxp, P), read once

        def bn_relu(y, gamma, beta):
            # One-pass batch stats: var = E[y^2] - mean^2 (no (y-mean) pass).
            s1 = jnp.sum(y, axis=1, keepdims=True)
            s2 = jnp.sum(y * y, axis=1, keepdims=True)
            mean = s1 * inv_p
            var = s2 * inv_p - mean * mean
            scale = gamma * jax.lax.rsqrt(var + BN_EPS)
            shift = beta - mean * scale
            return jnp.maximum(y * scale + shift, 0.0)

        # Per-pixel (row, col) coordinates along the lane axis for the 3x3
        # boundary masks (cross-image roll wrap is always in a masked position).
        lane = jax.lax.broadcasted_iota(jnp.int32, (F, P), 1)
        jj = lane % W
        ii = (lane // W) % H

        def fill_taps(h, ph_ref):
            # Build the (9*F, P) im2col slab of h in VMEM scratch with
            # XLU rolls + boundary masks (tap t rows [t*F, (t+1)*F)).
            for t, (di, dj) in enumerate(taps):
                if di == 0 and dj == 0:
                    tap = h
                else:
                    s = di * W + dj                       # tap[p] = h[p + s]
                    shift = (-s) % P if roll_like_numpy else s % P
                    rolled = pltpu.roll(h, shift, axis=1)
                    keep = ((ii + di >= 0) & (ii + di < H) &
                            (jj + dj >= 0) & (jj + dj < W))
                    tap = jnp.where(keep, rolled, 0.0)
                ph_ref[t * F:(t + 1) * F, :] = tap

        # ConvX 1 (conv bias dropped: it cancels in training-mode BN).
        h1 = bn_relu(jnp.dot(w1x_ref[...], px, preferred_element_type=f32),
                     g1_ref[...], b1_ref[...])
        fill_taps(h1, ph1_ref)
        ph1 = ph1_ref[...]

        # ConvX 2 on concat([x, h1]) expressed as two accumulated dots.
        y2 = (jnp.dot(w2x_ref[...], px, preferred_element_type=f32)
              + jnp.dot(w2h_ref[...], ph1, preferred_element_type=f32))
        h2 = bn_relu(y2, g2_ref[...], b2_ref[...])
        fill_taps(h2, ph2_ref)

        # Transition conv on concat([x, h1, h2]) (bias kept: no BN follows).
        t_out = (jnp.dot(wtx_ref[...], px, preferred_element_type=f32)
                 + jnp.dot(wt1_ref[...], ph1, preferred_element_type=f32)
                 + jnp.dot(wt2_ref[...], ph2_ref[...], preferred_element_type=f32)
                 + tb_ref[...])                            # (C, P)

        # AvgPool2d(2,2) and the SE squeeze both read t_out (independent dots).
        pooled = jnp.dot(t_out, pool_ref[...], preferred_element_type=f32)  # (C, Pp)
        sq = jnp.dot(t_out, sqd_ref[...], preferred_element_type=f32)       # (C, N)

        z1 = jnp.maximum(jnp.dot(f1w_ref[...], sq, preferred_element_type=f32)
                         + f1b_ref[...], 0.0)                               # (C/2, N)
        z2 = jnp.dot(f2w_ref[...], z1, preferred_element_type=f32) + f2b_ref[...]
        gate = 1.0 / (1.0 + jnp.exp(-z2))                                   # (C, N)

        gate_full = jnp.dot(gate, ex_ref[...], preferred_element_type=f32)  # (C, Pp)
        out_ref[...] = (pooled * gate_full).astype(out_ref.dtype)

    return kernel


# --------------------------------------------------------------------------- #
# Wrapper-side glue (layout / im2col of the block INPUT only)
# --------------------------------------------------------------------------- #
def _im2col_cm(x_cm, k=3, pad=1):
    """Channel-major im2col: (C, N, H, W) -> (k*k*C, N*H*W), (tap, channel) rows."""
    c, n, h, w = x_cm.shape
    xp = jnp.pad(x_cm, ((0, 0), (0, 0), (pad, pad), (pad, pad)))
    taps = [xp[:, :, i:i + h, j:j + w].reshape(c, n * h * w)
            for i in range(k) for j in range(k)]
    return jnp.concatenate(taps, axis=0)


def _weight_slab(w_oihw):
    """(Cout, Cin, 3, 3) -> (Cout, 9*Cin) with (tap, channel) column order."""
    co = w_oihw.shape[0]
    return jnp.transpose(w_oihw, (0, 2, 3, 1)).reshape(co, -1)


def _pool_se_consts(n, h, w):
    """Host-side numpy constants: avg-pool matrix, direct-squeeze matrix,
    per-image gate broadcast matrix."""
    hp, wp = h // 2, w // 2
    P, Pp = n * h * w, n * hp * wp
    p = np.arange(P)
    jn, im, nn = p % w, (p // w) % h, p // (h * w)
    q_of_p = (nn * hp + im // 2) * wp + jn // 2
    pool_m = np.zeros((P, Pp), np.float32)
    pool_m[p, q_of_p] = 0.25
    sqd_m = np.zeros((P, n), np.float32)           # mean over pooled == mean over t
    sqd_m[p, nn] = 1.0 / (h * w)
    q = np.arange(Pp)
    ex_m = np.zeros((n, Pp), np.float32)
    ex_m[q // (hp * wp), q] = 1.0
    return pool_m, sqd_m, ex_m


@functools.partial(jax.jit, static_argnames=("roll_like_numpy",))
def _forward_impl(x_nchw, params, *, roll_like_numpy):
    (cw1, _cb1, bg1, bb1, cw2, _cb2, bg2, bb2,      # conv biases unused: cancel in BN
     tw, tb, f1w, f1b, f2w, f2b) = params
    n, cin, h, w = x_nchw.shape
    f = cw1.shape[0]                                 # filters
    c = tw.shape[0]                                  # output_channels
    hp, wp = h // 2, w // 2
    P, Pp = n * h * w, n * hp * wp
    dt = x_nchw.dtype

    # Channel-major im2col of the block input only; pad K to a sublane multiple.
    px = _im2col_cm(jnp.transpose(x_nchw, (1, 0, 2, 3)))        # (9*Cin, P)
    kx = px.shape[0]
    kxp = -(-kx // 8) * 8
    px = jnp.pad(px, ((0, kxp - kx), (0, 0)))

    def padk(slab):
        return jnp.pad(slab, ((0, 0), (0, kxp - slab.shape[1])))

    w1x = padk(_weight_slab(cw1))                    # (F, Kxp)
    w2x = padk(_weight_slab(cw2[:, :cin]))           # (F, Kxp)
    w2h = _weight_slab(cw2[:, cin:])                 # (F, 9F)
    wtx = padk(_weight_slab(tw[:, :cin]))            # (C, Kxp)
    wt1 = _weight_slab(tw[:, cin:cin + f])           # (C, 9F)
    wt2 = _weight_slab(tw[:, cin + f:])              # (C, 9F)

    pool_m, sqd_m, ex_m = _pool_se_consts(n, h, w)   # numpy constants

    col = lambda v: v.reshape(-1, 1)
    out_cm = pl.pallas_call(
        _make_fused_kernel(h, w, f, P, roll_like_numpy),
        out_shape=jax.ShapeDtypeStruct((c, Pp), dt),
        in_specs=[_VMEM] * 19,
        out_specs=_VMEM,
        scratch_shapes=[pltpu.VMEM((9 * f, P), jnp.float32),    # h1 tap slab
                        pltpu.VMEM((9 * f, P), jnp.float32)],   # h2 tap slab
    )(px, w1x, col(bg1), col(bb1),
      w2x, w2h, col(bg2), col(bb2),
      wtx, wt1, wt2, col(tb),
      jnp.asarray(pool_m, dtype=dt), jnp.asarray(sqd_m, dtype=dt),
      jnp.asarray(ex_m, dtype=dt),
      f1w, col(f1b), f2w, col(f2b))

    # Boundary glue back to PyTorch NCHW.
    return jnp.transpose(out_cm.reshape(c, n, hp, wp), (1, 0, 2, 3))


def dense_block_forward(x_nchw, params):
    """dense_block(num_conv=2, down_sample=True) forward. NCHW in / NCHW out."""
    return _forward_impl(x_nchw, params, roll_like_numpy=_roll_like_numpy())


# --------------------------------------------------------------------------- #
# Pure-JAX reference (mirrors the PyTorch module in training mode)
# --------------------------------------------------------------------------- #
def reference_forward(x, params, eps=BN_EPS):
    (cw1, cb1, bg1, bb1, cw2, cb2, bg2, bb2,
     tw, tb, f1w, f1b, f2w, f2b) = params

    def conv(xx, wgt, b):
        y = jax.lax.conv_general_dilated(
            xx, wgt, (1, 1), ((1, 1), (1, 1)),
            dimension_numbers=("NCHW", "OIHW", "NCHW"))
        return y + b.reshape(1, -1, 1, 1)

    def convx(xx, wgt, b, gamma, beta):
        y = conv(xx, wgt, b)
        mean = y.mean(axis=(0, 2, 3), keepdims=True)
        var = ((y - mean) ** 2).mean(axis=(0, 2, 3), keepdims=True)
        y = (y - mean) * jax.lax.rsqrt(var + eps)
        y = y * gamma.reshape(1, -1, 1, 1) + beta.reshape(1, -1, 1, 1)
        return jnp.maximum(y, 0.0)

    c1 = convx(x, cw1, cb1, bg1, bb1)
    c2 = convx(jnp.concatenate([x, c1], axis=1), cw2, cb2, bg2, bb2)
    t = conv(jnp.concatenate([x, c1, c2], axis=1), tw, tb)
    n, c, h, w = t.shape
    pooled = t.reshape(n, c, h // 2, 2, w // 2, 2).mean(axis=(3, 5))
    sq = pooled.mean(axis=(2, 3))
    z1 = jnp.maximum(sq @ f1w.T + f1b, 0.0)
    gate = jax.nn.sigmoid(z1 @ f2w.T + f2b)
    return pooled * gate[:, :, None, None]


# --------------------------------------------------------------------------- #
if __name__ == "__main__":
    N, Cin, H, W = 2, 4, 16, 16
    filters, out_channels = 8, 8
    red = out_channels // 2
    f32 = jnp.float32

    key = jax.random.PRNGKey(0)
    ks = jax.random.split(key, 15)

    x = jax.random.normal(ks[0], (N, Cin, H, W), f32)

    cw1 = 0.1 * jax.random.normal(ks[1], (filters, Cin, 3, 3), f32)
    cb1 = 0.1 * jax.random.normal(ks[2], (filters,), f32)
    bg1 = 1.0 + 0.1 * jax.random.normal(ks[3], (filters,), f32)
    bb1 = 0.1 * jax.random.normal(ks[4], (filters,), f32)

    cw2 = 0.1 * jax.random.normal(ks[5], (filters, Cin + filters, 3, 3), f32)
    cb2 = 0.1 * jax.random.normal(ks[6], (filters,), f32)
    bg2 = 1.0 + 0.1 * jax.random.normal(ks[7], (filters,), f32)
    bb2 = 0.1 * jax.random.normal(ks[8], (filters,), f32)

    tw = 0.1 * jax.random.normal(ks[9], (out_channels, Cin + 2 * filters, 3, 3), f32)
    tb = 0.1 * jax.random.normal(ks[10], (out_channels,), f32)

    f1w = 0.3 * jax.random.normal(ks[11], (red, out_channels), f32)
    f1b = 0.1 * jax.random.normal(ks[12], (red,), f32)
    f2w = 0.3 * jax.random.normal(ks[13], (out_channels, red), f32)
    f2b = 0.1 * jax.random.normal(ks[14], (out_channels,), f32)

    params = (cw1, cb1, bg1, bb1, cw2, cb2, bg2, bb2,
              tw, tb, f1w, f1b, f2w, f2b)

    out = dense_block_forward(x, params)
    out = jax.block_until_ready(out)

    ref = reference_forward(x, params)
    assert out.shape == (N, out_channels, H // 2, W // 2), out.shape
    max_err = float(jnp.max(jnp.abs(out - ref)))
    assert jnp.allclose(out, ref, rtol=2e-4, atol=2e-4), max_err

    print("KERNEL_OK")
</pallas_src>

<mosaic_0001>
module attributes {stable_mosaic.version = 11 : i64} {
  func.func @probe(%arg0: memref<8x128xf32, #tpu.memory_space<vmem>>, %arg1: memref<8x128xf32, #tpu.memory_space<vmem>>) attributes {dimension_semantics = [], scalar_prefetch = 0 : i64, scratch_operands = 0 : i64, tpu.core_type = #tpu.core_type<tc>} {
    %c0 = arith.constant 0 : index
    %c0_0 = arith.constant 0 : index
    %0 = vector.load %arg0[%c0, %c0_0] : memref<8x128xf32, #tpu.memory_space<vmem>>, vector<8x128xf32>
    %c1_i32 = arith.constant 1 : i32
    %1 = tpu.dynamic_rotate %0 by %c1_i32 dim 1 : vector<8x128xf32>, i32 -> vector<8x128xf32>
    %c0_1 = arith.constant 0 : index
    %c0_2 = arith.constant 0 : index
    %2 = vector.load %arg1[%c0_1, %c0_2] : memref<8x128xf32, #tpu.memory_space<vmem>>, vector<8x128xf32>
    tpu.vector_store %arg1[%c0_1, %c0_2], %1 {strides = array<i32>} : memref<8x128xf32, #tpu.memory_space<vmem>>, vector<8x128xf32>,
    return
  }
}

</mosaic_0001>

<bundles_post_ra>
// kernel: tpu_custom_call.1
= control target key start
LH: loop header
LB: loop body
LE: loop exit
PB: predicated region body
PF: predicated region fallthrough
CT: control target
= control target key end

     0   :  { %6 = vsyncpa [#allocation3], 0  ;;  %s118_s0 = inlined_call_operand.hbm [shape: f32[8,128], index: 0, kind: input, shape index: {}]   ;;  %s119_s1 = inlined_call_operand.hbm [shape: f32[8,128], index: 1, kind: output, shape index: {}]  }
   0x1   :  { %7 = vsyncpa [#allocation4], 0  ;;  %s13_s8 = sshll.u32 %s118_s0, 4  ;;  %s99_s9 = smov [#allocation2]   ;;  %s14_s8 = int_to_ptr.hbm [resolvable:$true] %s13_s8 }
   0x2   :  { %s15_s10 = sshll.u32 %s99_s9, 4  ;;  %s16_s10 = int_to_ptr.vmem [resolvable:$true] %s15_s10 }
   0x3   :  { %18 = dma.hbm_to_vmem [thread:$0]  %s14_s8, 128, %s16_s10, [#allocation3]  }
   0x4   :  { %95 = dma.done.wait [#allocation3], 128  }
   0x5   :  { %96 = vsyncadd [#allocation3], 4294967168  ;;  %v23_v0 = vld [vmem:[#allocation2] sm:$0xff]  ;;  %s100_s11 = smov 1   ;;  %s101_s12 = smov [#allocation5]  }
   0x6   :  { %24 = vrot.lane.b32.xlu0 %v23_v0, %s100_s11  ;;  %s32_s13 = sshll.u32 %s101_s12, 4  ;;  %s34_s16 = sshll.u32 %s119_s1, 4  ;;  %s33_s13 = int_to_ptr.vmem [resolvable:$true] %s32_s13  ;;  %s35_s16 = int_to_ptr.hbm [resolvable:$true] %s34_s16 }
  0x78   :  { %v25_v1 = vpop.permute.xlu0 %24 }
  0x79   :  { %26 = vst [vmem:[#allocation5] sm:$0xff] %v25_v1 }
  0x7a   :  { %37 = dma.vmem_to_hbm [thread:$0]  %s33_s13, 128, %s35_s16, [#allocation4]  }
  0x7b   :  { %97 = dma.done.wait [#allocation4], 128  }
  0x7c   :  { %98 = vsyncadd [#allocation4], 4294967168 }
  0x7d   :  { %42 = vsyncpa [#allocation3], 1 }
  0x7e   :  { %43 = vsyncpa [#allocation4], 1 }

</bundles_post_ra>
